<compile_context>
chip_gen: v7x
topology: tpu7x:2x2x1
jax: 0.10.0
libtpu: 0.0.40
codegen_flags: <defaults>
</compile_context>

<pallas_src>
import functools

import jax
import jax.numpy as jnp
from jax.experimental import pallas as pl
from jax.experimental.pallas import tpu as pltpu

_LANE = 128
_MAX_SINGLE_L = 2048            # largest L kept as a single full-dim block
_TARGET_TILE_BYTES = 4 << 20    # ~4 MiB of input per grid step (v7x-safe)
_MAX_TILE_ROWS = 1024


def _cdiv(a: int, b: int) -> int:
    return -(-a // b)


def _round_up(a: int, b: int) -> int:
    return _cdiv(a, b) * b


def _sublane(dtype) -> int:
    return {4: 8, 2: 16, 1: 32}.get(jnp.dtype(dtype).itemsize, 8)


# --------------------------- kernel bodies -----------------------------------


def _lse_single_l_kernel(x_ref, o_ref):
    """L fits in one full-dim block: exp -> cross-lane sum -> log -> store.

    x_ref: (TILE_R, L)    o_ref: (TILE_R, 1)
    """
    e = jnp.exp(x_ref[...].astype(jnp.float32))
    o_ref[...] = jnp.log(jnp.sum(e, axis=-1, keepdims=True)).astype(o_ref.dtype)


def _lse_tiled_l_kernel(x_ref, o_ref, acc_ref, *, length, tile_l, mask_l):
    """L is tiled; VPU-accumulate exp() per 128-lane chunk into an f32 scratch.

    x_ref  : (TILE_R, TILE_L)  input tile (cast to f32 per chunk)
    o_ref  : (TILE_R, 1)       written on the last L step only
    acc_ref: (TILE_R, 128) f32 running lane-chunked sum of exp(x)
    """
    l = pl.program_id(1)

    @pl.when(l == 0)
    def _init():
        acc_ref[...] = jnp.zeros_like(acc_ref)

    if mask_l:
        lane = jax.lax.broadcasted_iota(jnp.int32, (1, _LANE), 1)
        col0 = l * tile_l
    neg_inf = jnp.float32(-jnp.inf)

    partial = None
    for c in range(tile_l // _LANE):
        xc = x_ref[:, c * _LANE:(c + 1) * _LANE].astype(jnp.float32)
        if mask_l:
            # Lanes whose global column index >= L hold stale-VMEM garbage on
            # the last (partial) L tile: force them to -inf so exp() == 0.
            xc = jnp.where(col0 + c * _LANE + lane < length, xc, neg_inf)
        ec = jnp.exp(xc)
        partial = ec if partial is None else partial + ec
    acc_ref[...] += partial

    @pl.when(l == pl.num_programs(1) - 1)
    def _finalize():
        s = jnp.sum(acc_ref[...], axis=-1, keepdims=True)     # (TILE_R, 1)
        o_ref[...] = jnp.log(s).astype(o_ref.dtype)


# ------------------------------ wrapper ---------------------------------------


def logsumexp_pooling1d(x: jax.Array) -> jax.Array:
    """Pallas TPU implementation of LogSumExpPooling1d.forward.

    Args:
      x: (N, C, L) floating-point array.
    Returns:
      (N, C, 1) array of log(sum(exp(x), axis=-1)), same dtype as x.
    """
    N, C, L = x.shape
    R = N * C
    itemsize = jnp.dtype(x.dtype).itemsize
    sub = _sublane(x.dtype)

    x2 = x.reshape(R, L)  # contiguous view; no HBM copy

    # ---- L tiling: keep L whole when it fits, else balanced 128-mult tiles ----
    if L <= _MAX_SINGLE_L:
        tile_l, n_l = L, 1
    else:
        n_l = _cdiv(L, _MAX_SINGLE_L)
        tile_l = _round_up(_cdiv(L, n_l), _LANE)
        n_l = _cdiv(L, tile_l)

    # ---- Row tiling: ~4 MiB of input per step; prefer >= 2 row tiles so both
    #      v7x TensorCores get work along the "parallel" axis. ----
    row_cap = _TARGET_TILE_BYTES // max(tile_l * itemsize, 1)
    row_cap = max(sub, min(_MAX_TILE_ROWS, (row_cap // sub) * sub))
    if R <= row_cap:
        tile_r = _round_up(_cdiv(R, 2), sub) if R >= 2 * sub else R
    else:
        tile_r = row_cap
    n_r = _cdiv(R, tile_r)

    out_shape = jax.ShapeDtypeStruct((R, 1), x.dtype)
    vmem_limit = 32 * 1024 * 1024

    if n_l == 1:
        out = pl.pallas_call(
            _lse_single_l_kernel,
            out_shape=out_shape,
            grid=(n_r,),
            in_specs=[pl.BlockSpec((tile_r, L), lambda r: (r, 0))],
            out_specs=pl.BlockSpec((tile_r, 1), lambda r: (r, 0)),
            compiler_params=pltpu.CompilerParams(
                dimension_semantics=("parallel",),
                vmem_limit_bytes=vmem_limit,
            ),
        )(x2)
    else:
        kernel = functools.partial(
            _lse_tiled_l_kernel,
            length=L, tile_l=tile_l, mask_l=(L % tile_l) != 0)
        out = pl.pallas_call(
            kernel,
            out_shape=out_shape,
            grid=(n_r, n_l),
            in_specs=[pl.BlockSpec((tile_r, tile_l), lambda r, l: (r, l))],
            out_specs=pl.BlockSpec((tile_r, 1), lambda r, l: (r, 0)),
            scratch_shapes=[pltpu.VMEM((tile_r, _LANE), jnp.float32)],
            compiler_params=pltpu.CompilerParams(
                dimension_semantics=("parallel", "arbitrary"),
                vmem_limit_bytes=vmem_limit,
            ),
        )(x2)

    return out.reshape(N, C, 1)


if __name__ == "__main__":
    key = jax.random.PRNGKey(0)

    def ref(x):
        return jnp.log(jnp.sum(jnp.exp(x.astype(jnp.float32)),
                               axis=-1, keepdims=True))

    # 1) Module's typical regime: small L, single-L path.  batch=2, ch=4, L=16.
    x = jax.random.normal(key, (2, 4, 16), dtype=jnp.float32)
    y = jax.block_until_ready(logsumexp_pooling1d(x))
    assert y.shape == (2, 4, 1), y.shape
    assert jnp.allclose(y, ref(x), atol=1e-5, rtol=1e-5), "mismatch (small L)"

    # 2) Large L: exercises the tiled-L reduction axis + in-kernel -inf masking
    #    of the partial last L tile (2500 -> two 1280-lane tiles).
    x2 = jax.random.normal(jax.random.PRNGKey(1), (1, 8, 2500), dtype=jnp.float32)
    y2 = jax.block_until_ready(logsumexp_pooling1d(x2))
    assert y2.shape == (1, 8, 1), y2.shape
    assert jnp.allclose(y2, ref(x2), atol=1e-5, rtol=1e-5), "mismatch (tiled L)"

    # 3) Multiple row tiles with a partial last row block (R=390, tile_r=200).
    x3 = jax.random.normal(jax.random.PRNGKey(2), (3, 130, 300), dtype=jnp.float32)
    y3 = jax.block_until_ready(logsumexp_pooling1d(x3))
    assert y3.shape == (3, 130, 1), y3.shape
    assert jnp.allclose(y3, ref(x3), atol=1e-5, rtol=1e-5), "mismatch (row tiles)"

    # 4) bf16 streaming (f32 accumulation in-kernel; tolerance = bf16 output cast).
    x4 = jax.random.normal(jax.random.PRNGKey(3), (2, 16, 64), dtype=jnp.bfloat16)
    y4 = jax.block_until_ready(logsumexp_pooling1d(x4))
    assert y4.shape == (2, 16, 1), y4.shape
    assert jnp.allclose(y4.astype(jnp.float32), ref(x4),
                        atol=5e-2, rtol=2e-2), "mismatch (bf16)"

    print("KERNEL_OK")
</pallas_src>

<mosaic_0001>
module attributes {stable_mosaic.version = 11 : i64} {
  func.func @_lse_single_l_kernel(%arg0: i32, %arg1: memref<8x16xf32, #tpu.memory_space<vmem>>, %arg2: memref<8x1xf32, #tpu.memory_space<vmem>>) attributes {dimension_semantics = [#tpu.dimension_semantics<parallel>], iteration_bounds = array<i64: 1>, scalar_prefetch = 0 : i64, scratch_operands = 0 : i64, tpu.core_type = #tpu.core_type<tc>, window_params = [{transform_indices = @transform_0, window_bounds = array<i64: 8, 16>}, {transform_indices = @transform_1, window_bounds = array<i64: 8, 1>}]} {
    %c0 = arith.constant 0 : index
    %c0_0 = arith.constant 0 : index
    %0 = vector.load %arg1[%c0, %c0_0] : memref<8x16xf32, #tpu.memory_space<vmem>>, vector<8x16xf32>
    %1 = math.exp %0 : vector<8x16xf32>
    %cst = arith.constant dense<0.000000e+00> : vector<8xf32>
    %2 = vector.multi_reduction <add>, %1, %cst [1] : vector<8x16xf32> to vector<8xf32>
    %3 = vector.shape_cast %2 : vector<8xf32> to vector<8x1xf32>
    %4 = math.log %3 : vector<8x1xf32>
    %c0_1 = arith.constant 0 : index
    %c0_2 = arith.constant 0 : index
    %5 = vector.load %arg2[%c0_1, %c0_2] : memref<8x1xf32, #tpu.memory_space<vmem>>, vector<8x1xf32>
    tpu.vector_store %arg2[%c0_1, %c0_2], %4 {strides = array<i32>} : memref<8x1xf32, #tpu.memory_space<vmem>>, vector<8x1xf32>,
    return
  }
  func.func @transform_0(%arg0: i32) -> (i32, i32) {
    %c0_i32 = arith.constant 0 : i32
    %c0_i32_0 = arith.constant 0 : i32
    return %arg0, %c0_i32 : i32, i32
  }
  func.func @transform_1(%arg0: i32) -> (i32, i32) {
    %c0_i32 = arith.constant 0 : i32
    %c0_i32_0 = arith.constant 0 : i32
    return %arg0, %c0_i32 : i32, i32
  }
}

</mosaic_0001>

<bundles_post_ra>
// kernel: tpu_custom_call.1
= control target key start
LH: loop header
LB: loop body
LE: loop exit
PB: predicated region body
PF: predicated region fallthrough
CT: control target
= control target key end

     0   :  { %6 = vsyncpa [#allocation3], 0  ;;  %s65_s6 = smov [#allocation2]   ;;  %s91_s0 = inlined_call_operand.hbm [shape: f32[8,16], index: 0, kind: input, shape index: {}]   ;;  %s92_s1 = inlined_call_operand.vmem [shape: f32[8,1], index: 1, kind: output, shape index: {}]  }
   0x1   :  { %s13_s7 = sshll.u32 %s65_s6, 4  ;;  %s41_s10 = scalar_lea.hbm %s91_s0, 128  ;;  %s14_s7 = int_to_ptr.vmem [resolvable:$true] %s13_s7 }
   0x2   :  { %p42_p0 = scmp.ne.s32.totalorder %s91_s0, %s41_s10  ;;  %p45_p1 = scmp.lt.u32.totalorder %s41_s10, %s91_s0 }
   0x4   :  { %p47_p2 = pnand %p45_p1, %p42_p0 }
   0x6   :  { %50 = shalt.err (!%p47_p2)
}
   0x7   :  { %s51_s15 = scalar_lea.vmem %s14_s7, 128  ;;  %p56_p4 = scmp.lt.s32.totalorder %s14_s7, %s14_s7 }
   0x8   :  { %p52_p3 = scmp.ne.s32.totalorder %s14_s7, %s51_s15  ;;  %p57_p5 = scmp.lt.s32.totalorder %s51_s15, %s51_s15 }
   0xa   :  { %p58_p6 = por %p57_p5, %p56_p4 }
   0xc   :  { %p59_p7 = pnand %p58_p6, %p52_p3 }
   0xe   :  { %62 = shalt.err (!%p59_p7)
}
   0xf   :  { %16 = dma.hbm_to_vmem [thread:$0]  %s91_s0, 128, %s14_s7, [#allocation3]  }
  0x10   :  { %63 = dma.done.wait [#allocation3], 128  }
  0x11   :  { %64 = vsyncadd [#allocation3], 4294967168  ;;  %v20_v0 = vld [vmem:[#allocation2] sm:$0xff]  ;;  %vm23_vm0 = vcmask 130048   ;;  %vm29_vm1 = vcmask 7168  }
  0x12   :  { %v21_v1 = vmul.f32 1.442695, %v20_v0 }
  0x14   :  { %37 = vpow2.f32 %v21_v1 }
  0x1e   :  { %v38_v2 = vpop.eup %37 }
  0x1f   :  { %v24_v3 = vsel %vm23_vm0, %v38_v2, 0.0 }
  0x20   :  { %25 = vadd.xlane.f32.xlu0 %v24_v3 }
  0xad   :  { %v26_v4 = vpop.xlane.xlu0 %25 }
  0xae   :  { %39 = vlog2.f32 %v26_v4 }
  0xb8   :  { %v40_v5 = vpop.eup %39 }
  0xb9   :  { %v28_v6 = vmul.f32 0.6931472, %v40_v5 }
  0xbb   :  { %30 = vst.msk [vmem:[%s92_s1] sm:$0xff] %vm29_vm1, %v28_v6 }
  0xbc   :  { %35 = vsyncpa [#allocation3], 1 }

</bundles_post_ra>
